<compile_context>
chip_gen: v5e
topology: v5e:2x2
jax: 0.10.0
libtpu: 0.0.40
codegen_flags: <defaults>
</compile_context>

<pallas_src>
import functools

import jax
import jax.numpy as jnp
from jax import lax
from jax.experimental import pallas as pl
from jax.experimental.pallas import tpu as pltpu


def _block_dec_kernel(H, W, N, C, x_ref, w_ref, b_ref, out_ref):
    """Whole batch in one step, fully lane/sublane-dense.

    x_ref   : (R, HW)        R = N*C rows (image-major, channel-minor), lane axis = H*W
    w_ref   : (2, R, 9*R)    [0]=conv2, [1]=conv1; BN-scale-folded, block-diag per image
    b_ref   : (2, R, 1)      folded BN shifts (beta - mean*scale), tiled over batch rows
    out_ref : (R, HW)
    """
    f32 = jnp.float32
    R = N * C
    HW = H * W

    x = x_ref[...].astype(f32)                              # (R, HW)

    # (h, w) coordinates of every output position along the lane axis.
    pos = lax.broadcasted_iota(jnp.int32, (R, HW), 1)
    if W & (W - 1) == 0:                                    # power-of-two W: shift/AND
        sh = W.bit_length() - 1
        h_idx = pos >> sh
        w_idx = pos & (W - 1)
    else:
        h_idx = pos // W
        w_idx = pos % W

    offsets = [(dy, dx) for dy in (-1, 0, 1) for dx in (-1, 0, 1)]

    def tap_mask(dy, dx):
        conds = []
        if dy < 0:
            conds.append(h_idx >= -dy)
        if dy > 0:
            conds.append(h_idx < H - dy)
        if dx < 0:
            conds.append(w_idx >= -dx)
        if dx > 0:
            conds.append(w_idx < W - dx)
        m = None
        for c in conds:
            m = c if m is None else jnp.logical_and(m, c)
        return m                                            # None for centre tap

    masks = [tap_mask(dy, dx) for dy, dx in offsets]        # built once, shared by both convs

    def conv_bn(a, idx):
        """3x3 'same' conv + folded BN of a (R, HW) slab via one fused MXU dot."""
        taps = []
        for (dy, dx), m in zip(offsets, masks):
            s = dy * W + dx                                 # tap reads a[:, p + s]
            tap = a if s == 0 else pltpu.roll(a, shift=(-s) % HW, axis=1)
            if m is not None:
                tap = jnp.where(m, tap, 0.0)                # zero padding at borders
            taps.append(tap)
        k = jnp.concatenate(taps, axis=0)                   # (9R, HW), 8-row-aligned slabs
        out = jnp.dot(w_ref[idx], k,                        # (R, 9R) @ (9R, HW)
                      preferred_element_type=f32,
                      precision=lax.Precision.HIGHEST)
        return out + b_ref[idx]                             # (R, HW) + (R, 1) shift

    # conv2 -> bn2 -> relu
    h1 = jnp.maximum(conv_bn(x, 0), 0.0)
    # conv1 -> bn1 -> identity shortcut -> relu
    o = conv_bn(h1, 1)
    o = jnp.maximum(o + x, 0.0)

    out_ref[...] = o.astype(out_ref.dtype)


def basic_block_dec(x_nchw, params, eps=1e-5):
    """BasicBlockDec forward, stride=1. x_nchw: [N, C, H, W] float32."""
    N, C, H, W = x_nchw.shape
    R = N * C
    HW = H * W

    # Free, contiguous reshape only — batch packed into the sublane axis.
    x_flat = x_nchw.reshape(R, HW)

    def fold_bn(gamma, beta, mean, var):
        scale = (gamma / jnp.sqrt(var + eps)).astype(jnp.float32)
        shift = (beta - mean * scale).astype(jnp.float32)
        return scale, shift

    def build_w_big(w, scale):
        # Fold BN scale into the output-channel axis of the conv weights.
        wf = w.astype(jnp.float32) * scale[:, None, None, None]     # (Cout, Cin, 3, 3)
        # Tap-major (ky, kx): wt[t, cout, cin]
        wt = jnp.transpose(wf, (2, 3, 0, 1)).reshape(9, C, C)
        eye = jnp.eye(N, dtype=jnp.float32)
        # Block-diagonal per image so one (R, 9R) @ (9R, HW) dot handles the batch.
        blocks = [jnp.kron(eye, wt[t]) for t in range(9)]            # each (R, R)
        return jnp.concatenate(blocks, axis=1)                       # (R, 9R)

    s2, b2 = fold_bn(params['bn2_gamma'], params['bn2_beta'],
                     params['bn2_mean'], params['bn2_var'])
    s1, b1 = fold_bn(params['bn1_gamma'], params['bn1_beta'],
                     params['bn1_mean'], params['bn1_var'])

    # Two consolidated parameter inputs: one weight slab, one shift slab.
    w_slab = jnp.stack([build_w_big(params['conv2_w'], s2),
                        build_w_big(params['conv1_w'], s1)], axis=0)  # (2, R, 9R)
    b_slab = jnp.stack([jnp.tile(b2, N),
                        jnp.tile(b1, N)], axis=0).reshape(2, R, 1)    # (2, R, 1)

    kern = functools.partial(_block_dec_kernel, H, W, N, C)

    out_flat = pl.pallas_call(
        kern,
        out_shape=jax.ShapeDtypeStruct((R, HW), x_nchw.dtype),
        grid_spec=pltpu.PrefetchScalarGridSpec(
            num_scalar_prefetch=0,
            grid=(1,),                                       # single full-batch step
            in_specs=[
                pl.BlockSpec((R, HW), lambda i: (0, 0)),          # x   (8, 256)
                pl.BlockSpec((2, R, 9 * R), lambda i: (0, 0, 0)), # weights (2, 8, 72)
                pl.BlockSpec((2, R, 1), lambda i: (0, 0, 0)),     # shifts  (2, 8, 1)
            ],
            out_specs=pl.BlockSpec((R, HW), lambda i: (0, 0)),
        ),
        compiler_params=pltpu.CompilerParams(
            dimension_semantics=("arbitrary",)),
    )(x_flat, w_slab, b_slab)

    return out_flat.reshape(N, C, H, W)


def basic_block_dec_reference(x, params, eps=1e-5):
    """Pure-JAX reference (matches PyTorch eval-mode forward, stride=1)."""

    def conv(a, w):
        return lax.conv_general_dilated(
            a, w, window_strides=(1, 1), padding=((1, 1), (1, 1)),
            dimension_numbers=('NCHW', 'OIHW', 'NCHW'),
            precision=lax.Precision.HIGHEST)

    def bn(a, g, b, m, v):
        g = g[None, :, None, None]
        b = b[None, :, None, None]
        m = m[None, :, None, None]
        v = v[None, :, None, None]
        return g * (a - m) / jnp.sqrt(v + eps) + b

    out = jax.nn.relu(bn(conv(x, params['conv2_w']),
                         params['bn2_gamma'], params['bn2_beta'],
                         params['bn2_mean'], params['bn2_var']))
    out = bn(conv(out, params['conv1_w']),
             params['bn1_gamma'], params['bn1_beta'],
             params['bn1_mean'], params['bn1_var'])
    out = out + x  # identity shortcut (stride == 1)
    return jax.nn.relu(out)


def make_params(key, C):
    ks = jax.random.split(key, 10)
    return {
        'conv2_w': jax.random.normal(ks[0], (C, C, 3, 3), jnp.float32) * 0.2,
        'conv1_w': jax.random.normal(ks[1], (C, C, 3, 3), jnp.float32) * 0.2,
        'bn2_gamma': 1.0 + 0.1 * jax.random.normal(ks[2], (C,), jnp.float32),
        'bn2_beta': 0.1 * jax.random.normal(ks[3], (C,), jnp.float32),
        'bn2_mean': 0.1 * jax.random.normal(ks[4], (C,), jnp.float32),
        'bn2_var': 0.5 + jnp.abs(jax.random.normal(ks[5], (C,), jnp.float32)),
        'bn1_gamma': 1.0 + 0.1 * jax.random.normal(ks[6], (C,), jnp.float32),
        'bn1_beta': 0.1 * jax.random.normal(ks[7], (C,), jnp.float32),
        'bn1_mean': 0.1 * jax.random.normal(ks[8], (C,), jnp.float32),
        'bn1_var': 0.5 + jnp.abs(jax.random.normal(ks[9], (C,), jnp.float32)),
    }


if __name__ == "__main__":
    key = jax.random.PRNGKey(0)
    kx, kp = jax.random.split(key)

    N, C, H, W = 2, 4, 16, 16  # in_planes=4, stride=1
    x = jax.random.normal(kx, (N, C, H, W), jnp.float32)
    params = make_params(kp, C)

    out = jax.block_until_ready(basic_block_dec(x, params))
    ref = jax.block_until_ready(basic_block_dec_reference(x, params))

    assert out.shape == (N, C, H, W), out.shape
    # Precision.HIGHEST restored on both the kernel dots and the reference conv,
    # so the tolerance is back to ~1e-4.
    assert jnp.allclose(out, ref, atol=1e-4, rtol=1e-4), (
        float(jnp.max(jnp.abs(out - ref))))

    print("KERNEL_OK")
</pallas_src>

<mosaic_0001>
module attributes {stable_mosaic.version = 11 : i64} {
  func.func @_block_dec_kernel(%arg0: i32, %arg1: memref<8x256xf32, #tpu.memory_space<vmem>>, %arg2: memref<2x8x72xf32, #tpu.memory_space<vmem>>, %arg3: memref<2x8x1xf32, #tpu.memory_space<vmem>>, %arg4: memref<8x256xf32, #tpu.memory_space<vmem>>) attributes {dimension_semantics = [#tpu.dimension_semantics<arbitrary>], iteration_bounds = array<i64: 1>, scalar_prefetch = 0 : i64, scratch_operands = 0 : i64, tpu.core_type = #tpu.core_type<tc>, window_params = [{pipeline_mode = #tpu.pipeline_mode<synchronous>, transform_indices = @transform_0, window_bounds = array<i64: 8, 256>}, {pipeline_mode = #tpu.pipeline_mode<synchronous>, transform_indices = @transform_1, window_bounds = array<i64: 2, 8, 72>}, {pipeline_mode = #tpu.pipeline_mode<synchronous>, transform_indices = @transform_2, window_bounds = array<i64: 2, 8, 1>}, {pipeline_mode = #tpu.pipeline_mode<synchronous>, transform_indices = @transform_3, window_bounds = array<i64: 8, 256>}]} {
    %c0 = arith.constant 0 : index
    %c0_0 = arith.constant 0 : index
    %0 = vector.load %arg1[%c0, %c0_0] : memref<8x256xf32, #tpu.memory_space<vmem>>, vector<8x256xf32>
    %1 = tpu.iota {dimensions = array<i32: 1>} : vector<8x256xi32>
    %c4_i32 = arith.constant 4 : i32
    %2 = vector.broadcast %c4_i32 : i32 to vector<8x256xi32>
    %3 = arith.shrsi %1, %2 : vector<8x256xi32>
    %c15_i32 = arith.constant 15 : i32
    %4 = vector.broadcast %c15_i32 : i32 to vector<8x256xi32>
    %5 = arith.andi %1, %4 : vector<8x256xi32>
    %c1_i32 = arith.constant 1 : i32
    %6 = vector.broadcast %c1_i32 : i32 to vector<8x256xi32>
    %7 = arith.cmpi sge, %3, %6 : vector<8x256xi32>
    %c1_i32_1 = arith.constant 1 : i32
    %8 = vector.broadcast %c1_i32_1 : i32 to vector<8x256xi32>
    %9 = arith.cmpi sge, %5, %8 : vector<8x256xi32>
    %10 = arith.andi %7, %9 : vector<8x256xi1>
    %c1_i32_2 = arith.constant 1 : i32
    %11 = vector.broadcast %c1_i32_2 : i32 to vector<8x256xi32>
    %12 = arith.cmpi sge, %3, %11 : vector<8x256xi32>
    %c1_i32_3 = arith.constant 1 : i32
    %13 = vector.broadcast %c1_i32_3 : i32 to vector<8x256xi32>
    %14 = arith.cmpi sge, %3, %13 : vector<8x256xi32>
    %c15_i32_4 = arith.constant 15 : i32
    %15 = vector.broadcast %c15_i32_4 : i32 to vector<8x256xi32>
    %16 = arith.cmpi slt, %5, %15 : vector<8x256xi32>
    %17 = arith.andi %14, %16 : vector<8x256xi1>
    %c1_i32_5 = arith.constant 1 : i32
    %18 = vector.broadcast %c1_i32_5 : i32 to vector<8x256xi32>
    %19 = arith.cmpi sge, %5, %18 : vector<8x256xi32>
    %c15_i32_6 = arith.constant 15 : i32
    %20 = vector.broadcast %c15_i32_6 : i32 to vector<8x256xi32>
    %21 = arith.cmpi slt, %5, %20 : vector<8x256xi32>
    %c15_i32_7 = arith.constant 15 : i32
    %22 = vector.broadcast %c15_i32_7 : i32 to vector<8x256xi32>
    %23 = arith.cmpi slt, %3, %22 : vector<8x256xi32>
    %c1_i32_8 = arith.constant 1 : i32
    %24 = vector.broadcast %c1_i32_8 : i32 to vector<8x256xi32>
    %25 = arith.cmpi sge, %5, %24 : vector<8x256xi32>
    %26 = arith.andi %23, %25 : vector<8x256xi1>
    %c15_i32_9 = arith.constant 15 : i32
    %27 = vector.broadcast %c15_i32_9 : i32 to vector<8x256xi32>
    %28 = arith.cmpi slt, %3, %27 : vector<8x256xi32>
    %c15_i32_10 = arith.constant 15 : i32
    %29 = vector.broadcast %c15_i32_10 : i32 to vector<8x256xi32>
    %30 = arith.cmpi slt, %3, %29 : vector<8x256xi32>
    %c15_i32_11 = arith.constant 15 : i32
    %31 = vector.broadcast %c15_i32_11 : i32 to vector<8x256xi32>
    %32 = arith.cmpi slt, %5, %31 : vector<8x256xi32>
    %33 = arith.andi %30, %32 : vector<8x256xi1>
    %c17_i32 = arith.constant 17 : i32
    %34 = tpu.dynamic_rotate %0 by %c17_i32 dim 1 : vector<8x256xf32>, i32 -> vector<8x256xf32>
    %cst = arith.constant 0.000000e+00 : f32
    %35 = vector.broadcast %cst : f32 to vector<8x256xf32>
    %36 = arith.select %10, %34, %35 : vector<8x256xi1>, vector<8x256xf32>
    %c16_i32 = arith.constant 16 : i32
    %37 = tpu.dynamic_rotate %0 by %c16_i32 dim 1 : vector<8x256xf32>, i32 -> vector<8x256xf32>
    %cst_12 = arith.constant 0.000000e+00 : f32
    %38 = vector.broadcast %cst_12 : f32 to vector<8x256xf32>
    %39 = arith.select %12, %37, %38 : vector<8x256xi1>, vector<8x256xf32>
    %c15_i32_13 = arith.constant 15 : i32
    %40 = tpu.dynamic_rotate %0 by %c15_i32_13 dim 1 : vector<8x256xf32>, i32 -> vector<8x256xf32>
    %cst_14 = arith.constant 0.000000e+00 : f32
    %41 = vector.broadcast %cst_14 : f32 to vector<8x256xf32>
    %42 = arith.select %17, %40, %41 : vector<8x256xi1>, vector<8x256xf32>
    %c1_i32_15 = arith.constant 1 : i32
    %43 = tpu.dynamic_rotate %0 by %c1_i32_15 dim 1 : vector<8x256xf32>, i32 -> vector<8x256xf32>
    %cst_16 = arith.constant 0.000000e+00 : f32
    %44 = vector.broadcast %cst_16 : f32 to vector<8x256xf32>
    %45 = arith.select %19, %43, %44 : vector<8x256xi1>, vector<8x256xf32>
    %c255_i32 = arith.constant 255 : i32
    %46 = tpu.dynamic_rotate %0 by %c255_i32 dim 1 : vector<8x256xf32>, i32 -> vector<8x256xf32>
    %cst_17 = arith.constant 0.000000e+00 : f32
    %47 = vector.broadcast %cst_17 : f32 to vector<8x256xf32>
    %48 = arith.select %21, %46, %47 : vector<8x256xi1>, vector<8x256xf32>
    %c241_i32 = arith.constant 241 : i32
    %49 = tpu.dynamic_rotate %0 by %c241_i32 dim 1 : vector<8x256xf32>, i32 -> vector<8x256xf32>
    %cst_18 = arith.constant 0.000000e+00 : f32
    %50 = vector.broadcast %cst_18 : f32 to vector<8x256xf32>
    %51 = arith.select %26, %49, %50 : vector<8x256xi1>, vector<8x256xf32>
    %c240_i32 = arith.constant 240 : i32
    %52 = tpu.dynamic_rotate %0 by %c240_i32 dim 1 : vector<8x256xf32>, i32 -> vector<8x256xf32>
    %cst_19 = arith.constant 0.000000e+00 : f32
    %53 = vector.broadcast %cst_19 : f32 to vector<8x256xf32>
    %54 = arith.select %28, %52, %53 : vector<8x256xi1>, vector<8x256xf32>
    %c239_i32 = arith.constant 239 : i32
    %55 = tpu.dynamic_rotate %0 by %c239_i32 dim 1 : vector<8x256xf32>, i32 -> vector<8x256xf32>
    %cst_20 = arith.constant 0.000000e+00 : f32
    %56 = vector.broadcast %cst_20 : f32 to vector<8x256xf32>
    %57 = arith.select %33, %55, %56 : vector<8x256xi1>, vector<8x256xf32>
    %58 = tpu.concatenate %36, %39, %42, %45, %0, %48, %51, %54, %57 in 0 : vector<8x256xf32>, vector<8x256xf32>, vector<8x256xf32>, vector<8x256xf32>, vector<8x256xf32>, vector<8x256xf32>, vector<8x256xf32>, vector<8x256xf32>, vector<8x256xf32> -> vector<72x256xf32>
    %c0_21 = arith.constant 0 : index
    %c0_22 = arith.constant 0 : index
    %c0_23 = arith.constant 0 : index
    %59 = vector.load %arg2[%c0_21, %c0_22, %c0_23] : memref<2x8x72xf32, #tpu.memory_space<vmem>>, vector<1x8x72xf32>
    %60 = vector.shape_cast %59 : vector<1x8x72xf32> to vector<8x72xf32>
    %cst_24 = arith.constant dense<0.000000e+00> : vector<8x256xf32>
    %61 = tpu.matmul %60, %58, %cst_24 {dimension_numbers = #tpu.dot_dimension_numbers<[1], [0], [0], [1], [0, 0, 1, 1], [], []>, precision = #tpu.contract_precision<fp32>} : vector<8x72xf32>, vector<72x256xf32>, vector<8x256xf32> -> vector<8x256xf32>
    %c0_25 = arith.constant 0 : index
    %c0_26 = arith.constant 0 : index
    %c0_27 = arith.constant 0 : index
    %62 = vector.load %arg3[%c0_25, %c0_26, %c0_27] : memref<2x8x1xf32, #tpu.memory_space<vmem>>, vector<1x8x1xf32>
    %63 = vector.shape_cast %62 : vector<1x8x1xf32> to vector<8x1xf32>
    %64 = vector.broadcast %63 : vector<8x1xf32> to vector<8x256xf32>
    %65 = arith.addf %61, %64 : vector<8x256xf32>
    %cst_28 = arith.constant 0.000000e+00 : f32
    %66 = vector.broadcast %cst_28 : f32 to vector<8x256xf32>
    %67 = arith.maximumf %65, %66 : vector<8x256xf32>
    %c17_i32_29 = arith.constant 17 : i32
    %68 = tpu.dynamic_rotate %67 by %c17_i32_29 dim 1 : vector<8x256xf32>, i32 -> vector<8x256xf32>
    %cst_30 = arith.constant 0.000000e+00 : f32
    %69 = vector.broadcast %cst_30 : f32 to vector<8x256xf32>
    %70 = arith.select %10, %68, %69 : vector<8x256xi1>, vector<8x256xf32>
    %c16_i32_31 = arith.constant 16 : i32
    %71 = tpu.dynamic_rotate %67 by %c16_i32_31 dim 1 : vector<8x256xf32>, i32 -> vector<8x256xf32>
    %cst_32 = arith.constant 0.000000e+00 : f32
    %72 = vector.broadcast %cst_32 : f32 to vector<8x256xf32>
    %73 = arith.select %12, %71, %72 : vector<8x256xi1>, vector<8x256xf32>
    %c15_i32_33 = arith.constant 15 : i32
    %74 = tpu.dynamic_rotate %67 by %c15_i32_33 dim 1 : vector<8x256xf32>, i32 -> vector<8x256xf32>
    %cst_34 = arith.constant 0.000000e+00 : f32
    %75 = vector.broadcast %cst_34 : f32 to vector<8x256xf32>
    %76 = arith.select %17, %74, %75 : vector<8x256xi1>, vector<8x256xf32>
    %c1_i32_35 = arith.constant 1 : i32
    %77 = tpu.dynamic_rotate %67 by %c1_i32_35 dim 1 : vector<8x256xf32>, i32 -> vector<8x256xf32>
    %cst_36 = arith.constant 0.000000e+00 : f32
    %78 = vector.broadcast %cst_36 : f32 to vector<8x256xf32>
    %79 = arith.select %19, %77, %78 : vector<8x256xi1>, vector<8x256xf32>
    %c255_i32_37 = arith.constant 255 : i32
    %80 = tpu.dynamic_rotate %67 by %c255_i32_37 dim 1 : vector<8x256xf32>, i32 -> vector<8x256xf32>
    %cst_38 = arith.constant 0.000000e+00 : f32
    %81 = vector.broadcast %cst_38 : f32 to vector<8x256xf32>
    %82 = arith.select %21, %80, %81 : vector<8x256xi1>, vector<8x256xf32>
    %c241_i32_39 = arith.constant 241 : i32
    %83 = tpu.dynamic_rotate %67 by %c241_i32_39 dim 1 : vector<8x256xf32>, i32 -> vector<8x256xf32>
    %cst_40 = arith.constant 0.000000e+00 : f32
    %84 = vector.broadcast %cst_40 : f32 to vector<8x256xf32>
    %85 = arith.select %26, %83, %84 : vector<8x256xi1>, vector<8x256xf32>
    %c240_i32_41 = arith.constant 240 : i32
    %86 = tpu.dynamic_rotate %67 by %c240_i32_41 dim 1 : vector<8x256xf32>, i32 -> vector<8x256xf32>
    %cst_42 = arith.constant 0.000000e+00 : f32
    %87 = vector.broadcast %cst_42 : f32 to vector<8x256xf32>
    %88 = arith.select %28, %86, %87 : vector<8x256xi1>, vector<8x256xf32>
    %c239_i32_43 = arith.constant 239 : i32
    %89 = tpu.dynamic_rotate %67 by %c239_i32_43 dim 1 : vector<8x256xf32>, i32 -> vector<8x256xf32>
    %cst_44 = arith.constant 0.000000e+00 : f32
    %90 = vector.broadcast %cst_44 : f32 to vector<8x256xf32>
    %91 = arith.select %33, %89, %90 : vector<8x256xi1>, vector<8x256xf32>
    %92 = tpu.concatenate %70, %73, %76, %79, %67, %82, %85, %88, %91 in 0 : vector<8x256xf32>, vector<8x256xf32>, vector<8x256xf32>, vector<8x256xf32>, vector<8x256xf32>, vector<8x256xf32>, vector<8x256xf32>, vector<8x256xf32>, vector<8x256xf32> -> vector<72x256xf32>
    %c1 = arith.constant 1 : index
    %c0_45 = arith.constant 0 : index
    %c0_46 = arith.constant 0 : index
    %93 = vector.load %arg2[%c1, %c0_45, %c0_46] : memref<2x8x72xf32, #tpu.memory_space<vmem>>, vector<1x8x72xf32>
    %94 = vector.shape_cast %93 : vector<1x8x72xf32> to vector<8x72xf32>
    %cst_47 = arith.constant dense<0.000000e+00> : vector<8x256xf32>
    %95 = tpu.matmul %94, %92, %cst_47 {dimension_numbers = #tpu.dot_dimension_numbers<[1], [0], [0], [1], [0, 0, 1, 1], [], []>, precision = #tpu.contract_precision<fp32>} : vector<8x72xf32>, vector<72x256xf32>, vector<8x256xf32> -> vector<8x256xf32>
    %c1_48 = arith.constant 1 : index
    %c0_49 = arith.constant 0 : index
    %c0_50 = arith.constant 0 : index
    %96 = vector.load %arg3[%c1_48, %c0_49, %c0_50] : memref<2x8x1xf32, #tpu.memory_space<vmem>>, vector<1x8x1xf32>
    %97 = vector.shape_cast %96 : vector<1x8x1xf32> to vector<8x1xf32>
    %98 = vector.broadcast %97 : vector<8x1xf32> to vector<8x256xf32>
    %99 = arith.addf %95, %98 : vector<8x256xf32>
    %100 = arith.addf %99, %0 : vector<8x256xf32>
    %cst_51 = arith.constant 0.000000e+00 : f32
    %101 = vector.broadcast %cst_51 : f32 to vector<8x256xf32>
    %102 = arith.maximumf %100, %101 : vector<8x256xf32>
    %c0_52 = arith.constant 0 : index
    %c0_53 = arith.constant 0 : index
    %103 = vector.load %arg4[%c0_52, %c0_53] : memref<8x256xf32, #tpu.memory_space<vmem>>, vector<8x256xf32>
    tpu.vector_store %arg4[%c0_52, %c0_53], %102 {strides = array<i32>} : memref<8x256xf32, #tpu.memory_space<vmem>>, vector<8x256xf32>,
    return
  }
  func.func @transform_0(%arg0: i32) -> (i32, i32) {
    %c0_i32 = arith.constant 0 : i32
    %c0_i32_0 = arith.constant 0 : i32
    %c0_i32_1 = arith.constant 0 : i32
    return %c0_i32, %c0_i32_0 : i32, i32
  }
  func.func @transform_1(%arg0: i32) -> (i32, i32, i32) {
    %c0_i32 = arith.constant 0 : i32
    %c0_i32_0 = arith.constant 0 : i32
    %c0_i32_1 = arith.constant 0 : i32
    %c0_i32_2 = arith.constant 0 : i32
    return %c0_i32, %c0_i32_0, %c0_i32_1 : i32, i32, i32
  }
  func.func @transform_2(%arg0: i32) -> (i32, i32, i32) {
    %c0_i32 = arith.constant 0 : i32
    %c0_i32_0 = arith.constant 0 : i32
    %c0_i32_1 = arith.constant 0 : i32
    %c0_i32_2 = arith.constant 0 : i32
    return %c0_i32, %c0_i32_0, %c0_i32_1 : i32, i32, i32
  }
  func.func @transform_3(%arg0: i32) -> (i32, i32) {
    %c0_i32 = arith.constant 0 : i32
    %c0_i32_0 = arith.constant 0 : i32
    %c0_i32_1 = arith.constant 0 : i32
    return %c0_i32, %c0_i32_0 : i32, i32
  }
}

</mosaic_0001>

<bundles_post_ra>
// kernel: tpu_custom_call.1
= control target key start
LH: loop header
LB: loop body
LE: loop exit
PB: predicated region body
PF: predicated region fallthrough
CT: control target
= control target key end

     0   :  { %8 = vsyncpa [#allocation3], 0  ;;  %s2300_s0 = inlined_call_operand.vmem [shape: f32[8,256], index: 0, kind: input, shape index: {}]   ;;  %s2301_s1 = inlined_call_operand.hbm [shape: f32[2,8,72], index: 1, kind: input, shape index: {}]   ;;  %s2302_s2 = inlined_call_operand.vmem [shape: f32[2,8,1], index: 2, kind: input, shape index: {}]   ;;  %s2303_s3 = inlined_call_operand.hbm [shape: f32[8,256], index: 3, kind: output, shape index: {}]  }
   0x1   :  { %9 = vsyncpa [#allocation4], 0  ;;  %s16_s14 = sshll.u32 %s2301_s1, 4  ;;  %s1310_s15 = smov [#allocation2]   ;;  %s17_s14 = int_to_ptr.hbm [resolvable:$true] %s16_s14 }
   0x2   :  { %s18_s16 = sshll.u32 %s1310_s15, 4  ;;  %s1311_s17 = smov 128   ;;  %s19_s16 = int_to_ptr.vmem [resolvable:$true] %s18_s16 }
   0x3   :  { %s1312_s18 = smov 8  }
   0x4   :  { %24 = dma.hbm_to_vmem [thread:$0]  %s17_s14, 256, %s19_s16, [#allocation3], %s1311_s17, %s1311_s17, %s1312_s18  }
   0x5   :  { %1306 = dma.done.wait [#allocation3], 256  }
   0x6   :  { %1307 = vsyncadd [#allocation3], 4294967040  ;;  %v1349_v0 = vld [vmem:[%s2300_s0] sm:$0xff]  ;;  %s1313_s21 = smov 112   ;;  %s1314_s22 = smov 111   ;;  %v1360_v1 = vld [vmem:[%s2300_s0 + $0x8] sm:$0xff]  ;;  %v33_v3 = vlaneseq }
   0x7   :  { %110 = vrot.lane.b32.xlu1 %v1349_v0, %s1313_s21  ;;  %119 = vrot.lane.b32.xlu0 %v1349_v0, %s1314_s22  ;;  %s1315_s1 = smov 113   ;;  %s1316_s25 = smov 127   ;;  %v1465_v31 = vand.u32 4294901760, %v1349_v0  ;;  %v128_v60 = vld [vmem:[#allocation2] sm:$0xff] }
   0x8   :  { %101 = vrot.lane.b32.xlu2 %v1349_v0, %s1315_s1  ;;  %s1317_s26 = smov 1   ;;  %s1318_s27 = smov 15   ;;  %v1390_v4 = vand.u32 127, %v33_v3 }
   0x9   :  { %s1319_s28 = smov 16   ;;  %s1320_s29 = smov 17   ;;  %v1498_v43 = vsub.f32 %v1349_v0, %v1465_v31 }
   0xa   :  { %v36_v5 = vshra.s32 %v1390_v4, 4  ;;  %v38_v6 = vand.u32 15, %v1390_v4  ;;  %vm105_vm2 = vcmp.lt.s32.totalorder %v1390_v4, 113  ;;  %vm114_vm5 = vcmp.lt.s32.totalorder %v1390_v4, 112  ;;  %s1322_s8 = smov [#allocation5]   ;;  %s1230_s12 = sshll.u32 %s2303_s3, 4  ;;  %s1231_s12 = int_to_ptr.hbm [resolvable:$true] %s1230_s12 }
   0xb   :  { %vm2306_vm6 = vcmp.lt.s32.totalorder %v1390_v4, 111  ;;  %v1431_v18 = vadd.s32 128, %v1390_v4  ;;  %vm2308_vm8 = vcmp.lt.s32.totalorder %v1390_v4, 127  ;;  %vm87_vm14 = vcmp.lt.s32.totalorder %v1390_v4, 1  ;;  %s1228_s9 = sshll.u32 %s1322_s8, 4  ;;  %s1229_s9 = int_to_ptr.vmem [resolvable:$true] %s1228_s9 }
   0xc   :  { %vm1394_vm0 = vcmp.ge.s32.totalorder %v38_v6, 1  ;;  %vm1398_vm1 = vcmp.lt.s32.totalorder %v36_v5, 15  ;;  %vm1418_vm4 = vcmp.lt.s32.totalorder %v38_v6, 15  ;;  %vm1510_vm12 = vcmp.ge.s32.totalorder %v36_v5, 1 }
   0xd   :  { %vm2304_vm3 = vmand %vm1398_vm1, %vm1394_vm0  ;;  %v39_v27 = vand.u32 15, %v1431_v18  ;;  %v37_v30 = vshra.s32 %v1431_v18, 4  ;;  %v2318_v54 = vand.u32 4294901760, %v1498_v43 }
   0xe   :  { %vm2305_vm7 = vmand %vm1398_vm1, %vm1418_vm4 }
   0xf   :  { %112 = vrot.lane.b32.xlu1 %v1360_v1, %s1313_s21  ;;  %121 = vrot.lane.b32.xlu0 %v1360_v1, %s1314_s22  ;;  %vm1473_vm9 = vcmp.ge.s32.totalorder %v39_v27, 1  ;;  %vm1486_vm10 = vcmp.lt.s32.totalorder %v37_v30, 15  ;;  %vm1500_vm11 = vcmp.lt.s32.totalorder %v39_v27, 15  ;;  %v207_v6 = vsub.f32 %v1498_v43, %v2318_v54 }
  0x10   :  { %103 = vrot.lane.b32.xlu2 %v1360_v1, %s1315_s1  ;;  %vm2309_vm13 = vmand %vm1486_vm10, %vm1473_vm9 }
  0x11   :  { %vm55_vm15 = vmand %vm1486_vm10, %vm1500_vm11  ;;  %v208_v27 = vand.u32 4294901760, %v207_v6 }
  0x17   :  { %94 = vrot.lane.b32.xlu1 %v1360_v1, %s1316_s25  ;;  %92 = vrot.lane.b32.xlu0 %v1349_v0, %s1316_s25 }
  0x18   :  { %83 = vrot.lane.b32.xlu2 %v1349_v0, %s1317_s26 }
  0x1f   :  { %74 = vrot.lane.b32.xlu1 %v1349_v0, %s1318_s27  ;;  %85 = vrot.lane.b32.xlu0 %v1360_v1, %s1317_s26 }
  0x20   :  { %76 = vrot.lane.b32.xlu2 %v1360_v1, %s1318_s27 }
  0x27   :  { %67 = vrot.lane.b32.xlu1 %v1360_v1, %s1319_s28  ;;  %65 = vrot.lane.b32.xlu0 %v1349_v0, %s1319_s28 }
  0x28   :  { %56 = vrot.lane.b32.xlu2 %v1349_v0, %s1320_s29 }
  0x2f   :  { %58 = vrot.lane.b32.xlu0 %v1360_v1, %s1320_s29 }
  0x62   :  { %v1388_v2 = vpop.permute.xlu2 %101 }
  0x6a   :  { %v1403_v9 = vpop.permute.xlu2 %103 }
  0x6b   :  { %v106_v12 = vsel %vm105_vm2, %v1388_v2, %v1403_v9  ;;  %v107_v55 = vsel %vm105_vm2, %v1403_v9, %v1388_v2 }
  0x6c   :  { %v108_v13 = vsel %vm2304_vm3, %v106_v12, 0.0  ;;  %vm2310_vm3 = vcmp.lt.s32.totalorder %v1390_v4, 15  ;;  %v109_v2 = vsel %vm2309_vm13, %v107_v55, 0.0 }
  0x6d   :  { %v1424_v15 = vand.u32 4294901760, %v108_v13 }
  0x6f   :  { %v1445_v23 = vsub.f32 %v108_v13, %v1424_v15 }
  0x71   :  { %v194_v34 = vand.u32 4294901760, %v1445_v23 }
  0x72   :  { %v1451_v26 = vpop.permute.xlu2 %83 }
  0x73   :  { %v195_v47 = vsub.f32 %v1445_v23, %v194_v34 }
  0x75   :  { %v196_v56 = vand.u32 4294901760, %v195_v47 }
  0x79   :  { %v111_v10 = vpop.permute.xlu1 %110  ;;  %v120_v11 = vpop.permute.xlu0 %119 }
  0x7a   :  { %v77_v53 = vpop.permute.xlu2 %76 }
  0x81   :  { %v113_v16 = vpop.permute.xlu1 %112  ;;  %v122_v17 = vpop.permute.xlu0 %121 }
  0x82   :  { %v115_v19 = vsel %vm114_vm5, %v111_v10, %v113_v16  ;;  %v124_v20 = vsel %vm2306_vm6, %v120_v11, %v122_v17  ;;  %v116_v51 = vsel %vm114_vm5, %v113_v16, %v111_v10  ;;  %v125_v52 = vsel %vm2306_vm6, %v122_v17, %v120_v11 }
  0x83   :  { %v117_v21 = vsel %vm1398_vm1, %v115_v19, 0.0  ;;  %v126_v22 = vsel %vm2305_vm7, %v124_v20, 0.0  ;;  %vm2307_vm7 = vmand %vm1510_vm12, %vm1418_vm4  ;;  %vm135_vm6 = vcmask 588800   ;;  %v118_v61 = vsel %vm1486_vm10, %v116_v51, 0.0 }
  0x84   :  { %v1447_v24 = vand.u32 4294901760, %v117_v21  ;;  %v1449_v25 = vand.u32 4294901760, %v126_v22  ;;  %v127_v62 = vsel %vm55_vm15, %v125_v52, 0.0  ;;  %v137_v11 = vsel %vm135_vm6, %v128_v60, 0 }
  0x85   :  { %v1579_v12 = vand.u32 4294901760, %v118_v61  ;;  %v1581_v13 = vand.u32 4294901760, %v127_v62  ;;  %v1588_v19 = vand.u32 4294901760, %v109_v2 }
  0x86   :  { %v1455_v28 = vsub.f32 %v117_v21, %v1447_v24  ;;  %v1458_v29 = vsub.f32 %v126_v22, %v1449_v25  ;;  %147 = vmatpush.msra.mxu0 %v1449_v25  ;;  %287 = vmatpush.msra.mxu3 %v1449_v25 }
  0x87   :  { %v1627_v51 = vsub.f32 %v109_v2, %v1588_v19 }
  0x88   :  { %149 = vmatpush.msra.mxu0 %v1447_v24  ;;  %248 = vmatpush.msra.mxu2 %v1458_v29  ;;  %v182_v32 = vand.u32 4294901760, %v1458_v29  ;;  %v188_v33 = vand.u32 4294901760, %v1455_v28 }
  0x89   :  { %289 = vmatpush.msra.mxu3 %v1447_v24  ;;  %v95_v35 = vpop.permute.xlu1 %94  ;;  %v93_v36 = vpop.permute.xlu0 %92 }
  0x8a   :  { %v97_v38 = vsel %vm2308_vm8, %v93_v36, %v95_v35  ;;  %151 = vmatpush.msra.mxu0 %v1424_v15  ;;  %251 = vmatpush.msra.mxu2 %v1455_v28  ;;  %v183_v39 = vsub.f32 %v1458_v29, %v182_v32  ;;  %v189_v42 = vsub.f32 %v1455_v28, %v188_v33 }
  0x8b   :  { %v99_v41 = vsel %vm1418_vm4, %v97_v38, 0.0  ;;  %291 = vmatpush.msra.mxu3 %v1424_v15  ;;  %v98_v16 = vsel %vm2308_vm8, %v95_v35, %v93_v36  ;;  %v1599_v35 = vand.u32 4294901760, %v137_v11  ;;  %vm1605_vm8 = vcmp.ge.s32.totalorder %v37_v30, 1 }
  0x8c   :  { %v1504_v45 = vand.u32 4294901760, %v99_v41  ;;  %254 = vmatpush.msra.mxu2 %v1445_v23  ;;  %v184_v46 = vand.u32 4294901760, %v183_v39  ;;  %v190_v50 = vand.u32 4294901760, %v189_v42  ;;  %v100_v36 = vsel %vm1500_vm11, %v98_v16, 0.0  ;;  %vm2311_vm13 = vmand %vm1605_vm8, %vm1500_vm11 }
  0x8d   :  { %v1614_v42 = vsub.f32 %v118_v61, %v1579_v12  ;;  %v1649_v61 = vsub.f32 %v137_v11, %v1599_v35 }
  0x8e   :  { %v1519_v49 = vsub.f32 %v99_v41, %v1504_v45  ;;  %153 = vmatpush.msra.mxu0 %v1504_v45  ;;  %185 = vmatpush.msra.mxu1 %v184_v46  ;;  %v1617_v46 = vsub.f32 %v127_v62, %v1581_v13 }
  0x8f   :  { %293 = vmatpush.msra.mxu3 %v1504_v45 }
  0x90   :  { %191 = vmatpush.msra.mxu1 %v190_v50  ;;  %257 = vmatpush.msra.mxu2 %v1519_v49  ;;  %v2320_v59 = vand.u32 4294901760, %v1519_v49  ;;  %v1624_v50 = vand.u32 4294901760, %v1360_v1 }
  0x91   :  { %v75_v57 = vpop.permute.xlu1 %74  ;;  %v86_v58 = vpop.permute.xlu0 %85  ;;  %155 = vmatpush.msra.mxu0 %v1465_v31  ;;  %295 = vmatpush.msra.mxu3 %v1465_v31 }
  0x92   :  { %v89_v63 = vsel %vm87_vm14, %v86_v58, %v1451_v26  ;;  %197 = vmatpush.msra.mxu1 %v196_v56  ;;  %v80_v0 = vsel %vm2310_vm3, %v77_v53, %v75_v57  ;;  %260 = vmatpush.msra.mxu2 %v1498_v43  ;;  %v201_v17 = vsub.f32 %v1519_v49, %v2320_v59  ;;  %v1638_v56 = vand.u32 4294901760, %v100_v36 }
  0x93   :  { %v90_v3 = vsel %vm1394_vm0, %v89_v63, 0.0  ;;  %v81_v5 = vsel %vm2307_vm7, %v80_v0, 0.0  ;;  %vm2312_vm7 = vcmp.lt.s32.totalorder %v1390_v4, 16  ;;  %v88_v18 = vsel %vm87_vm14, %v1451_v26, %v86_v58 }
  0x94   :  { %v1574_v9 = vand.u32 4294901760, %v90_v3  ;;  %v1576_v10 = vand.u32 4294901760, %v81_v5  ;;  %v202_v22 = vand.u32 4294901760, %v201_v17  ;;  %v79_v58 = vsel %vm2310_vm3, %v75_v57, %v77_v53  ;;  %v57_v17 = vpop.permute.xlu2 %56 }
  0x95   :  { %v91_v62 = vsel %vm1473_vm9, %v88_v18, 0.0  ;;  %v1659_v53 = vsub.f32 %v1360_v1, %v1624_v50  ;;  %v82_v57 = vsel %vm2311_vm13, %v79_v58, 0.0  ;;  %v1671_v11 = vsub.f32 %v100_v36, %v1638_v56  ;;  %vm2322_vm13 = vmand %vm1510_vm12, %vm1394_vm0 }
  0x96   :  { %v1591_v20 = vsub.f32 %v90_v3, %v1574_v9  ;;  %v1594_v21 = vsub.f32 %v81_v5, %v1576_v10  ;;  %157 = vmatpush.msra.mxu0 %v1574_v9  ;;  %297 = vmatpush.msra.mxu3 %v1574_v9  ;;  %v2314_v3 = vand.u32 4294901760, %v1617_v46  ;;  %v2313_v5 = vand.u32 4294901760, %v1614_v42 }
  0x97   :  { %203 = vmatpush.msra.mxu1 %v202_v22  ;;  %v1673_v16 = vand.u32 4294901760, %v91_v62  ;;  %vm60_vm3 = vcmp.lt.s32.totalorder %v1390_v4, 17  ;;  %v1687_v36 = vand.u32 4294901760, %v1649_v61  ;;  %v1689_v18 = vand.u32 4294901760, %v82_v57 }
  0x98   :  { %263 = vmatpush.msra.mxu2 %v1591_v20  ;;  %159 = vmatpush.msra.mxu0 %v1576_v10  ;;  %v2317_v39 = vand.u32 4294901760, %v1591_v20  ;;  %v2316_v41 = vand.u32 4294901760, %v1594_v21 }
  0x99   :  { %v68_v30 = vpop.permute.xlu1 %67  ;;  %v66_v47 = vpop.permute.xlu0 %65  ;;  %299 = vmatpush.msra.mxu3 %v1576_v10  ;;  %209 = vmatpush.msra.mxu1 %v208_v27  ;;  %v2319_v27 = vand.u32 4294901760, %v1627_v51 }
  0x9a   :  { %v71_v52 = vsel %vm2312_vm7, %v68_v30, %v66_v47  ;;  %266 = vmatpush.msra.mxu2 %v1594_v21  ;;  %v213_v26 = vsub.f32 %v1591_v20, %v2317_v39  ;;  %v219_v55 = vsub.f32 %v1594_v21, %v2316_v41  ;;  %v70_v1 = vsel %vm2312_vm7, %v66_v47, %v68_v30  ;;  %vm2321_vm7 = vmand %vm1605_vm8, %vm1473_vm9 }
  0x9b   :  { %v72_v60 = vsel %vm1510_vm12, %v71_v52, 0.0  ;;  %v433_v47 = vsub.f32 %v1617_v46, %v2314_v3  ;;  %v439_v52 = vsub.f32 %v1614_v42, %v2313_v5 }
  0x9c   :  { %v1653_v63 = vand.u32 4294901760, %v72_v60  ;;  %v214_v0 = vand.u32 4294901760, %v213_v26  ;;  %v220_v2 = vand.u32 4294901760, %v219_v55  ;;  %v456_v26 = vand.u32 4294901760, %v1659_v53 }
  0x9d   :  { %v73_v55 = vsel %vm1605_vm8, %v70_v1, 0.0  ;;  %v450_v1 = vand.u32 4294901760, %v1671_v11 }
  0x9e   :  { %v1667_v6 = vsub.f32 %v72_v60, %v1653_v63  ;;  %161 = vmatpush.msra.mxu0 %v1653_v63  ;;  %215 = vmatpush.msra.mxu1 %v214_v0  ;;  %v1729_v41 = vand.u32 4294901760, %v73_v55 }
  0x9f   :  { %301 = vmatpush.msra.mxu3 %v1653_v63 }
  0xa0   :  { %221 = vmatpush.msra.mxu1 %v220_v2  ;;  %269 = vmatpush.msra.mxu2 %v1667_v6  ;;  %v2315_v22 = vand.u32 4294901760, %v1667_v6  ;;  %v1712_v2 = vsub.f32 %v91_v62, %v1673_v16  ;;  %v167_v62 = vsub.f32 %v1649_v61, %v1687_v36  ;;  %v1752_v59 = vsub.f32 %v73_v55, %v1729_v41 }
  0xa1   :  { %v59_v30 = vpop.permute.xlu0 %58 }
  0xa2   :  { %v61_v58 = vsel %vm60_vm3, %v57_v17, %v59_v30  ;;  %v62_v60 = vsel %vm60_vm3, %v59_v30, %v57_v17  ;;  %v225_v0 = vsub.f32 %v1667_v6, %v2315_v22  ;;  %v1321_v22 = vmov 0  }
  0xa3   :  { %v63_v5 = vsel %vm2322_vm13, %v62_v60, 0.0  ;;  %v64_v17 = vsel %vm2321_vm7, %v61_v58, 0.0  ;;  %1254 = vset.pattern.permute.xlu1 %v1321_v22  ;;  %1255 = vset.pattern.permute.xlu0 %v1321_v22  ;;  %v1732_v60 = vsub.f32 %v82_v57, %v1689_v18  ;;  %v434_v58 = vand.u32 4294901760, %v433_v47  ;;  %vm2348_vm13 = vmand %vm1398_vm1, %vm1418_vm4 }
  0xa4   :  { %v1725_v30 = vand.u32 4294901760, %v63_v5  ;;  %v226_v3 = vand.u32 4294901760, %v225_v0  ;;  %v445_v0 = vsub.f32 %v1627_v51, %v2319_v27  ;;  %v1739_v54 = vand.u32 4294901760, %v64_v17 }
  0xa5   :  { %v440_v22 = vand.u32 4294901760, %v439_v52  ;;  %v462_v47 = vand.u32 4294901760, %v1712_v2  ;;  %v168_v27 = vand.u32 4294901760, %v167_v62  ;;  %v468_v52 = vand.u32 4294901760, %v1732_v60 }
  0xa6   :  { %v229_v39 = vsub.f32 %v63_v5, %v1725_v30  ;;  %163 = vmatpush.msra.mxu0 %v1725_v30  ;;  %227 = vmatpush.msra.mxu1 %v226_v3  ;;  %v457_v5 = vsub.f32 %v1659_v53, %v456_v26  ;;  %v451_v3 = vsub.f32 %v1671_v11, %v450_v1  ;;  %v446_v29 = vand.u32 4294901760, %v445_v0 }
  0xa7   :  { %303 = vmatpush.msra.mxu3 %v1725_v30  ;;  %169 = vmatmul.f32.vlgmr.msra.gmra.mxu0 %v168_v27  ;;  %v2339_v62 = vand.u32 4294901760, %v1519_v49  ;;  %v469_v23 = vsub.f32 %v1732_v60, %v468_v52  ;;  %vm2347_vm7 = vcmp.lt.s32.totalorder %v1390_v4, 111 }
  0xa8   :  { %321 = vmatpush.msrb.mxu0 %v182_v32  ;;  %272 = vmatpush.msra.mxu2 %v229_v39  ;;  %v230_v57 = vand.u32 4294901760, %v229_v39  ;;  %v452_v28 = vand.u32 4294901760, %v451_v3  ;;  %v458_v55 = vand.u32 4294901760, %v457_v5 }
  0xa9   :  { %435 = vmatpush.msrb.mxu3 %v434_v58  ;;  %275 = vmatmul.f32.vlgmr.msra.gmra.mxu2 %v1649_v61  ;;  %v1760_v58 = vsub.f32 %v64_v17, %v1739_v54  ;;  %v474_v17 = vand.u32 4294901760, %v1752_v59 }
  0xaa   :  { %325 = vmatpush.msrb.mxu0 %v188_v33  ;;  %397 = vmatpush.msrb.mxu2 %v1581_v13  ;;  %v231_v32 = vsub.f32 %v229_v39, %v230_v57  ;;  %v463_v39 = vsub.f32 %v1712_v2, %v462_v47 }
  0xab   :  { %441 = vmatpush.msrb.mxu3 %v440_v22  ;;  %v480_v0 = vand.u32 4294901760, %v1760_v58  ;;  %v2341_v22 = vand.u32 4294901760, %v1591_v20  ;;  %v475_v5 = vsub.f32 %v1752_v59, %v474_v17 }
  0xac   :  { %329 = vmatpush.msrb.mxu0 %v194_v34  ;;  %399 = vmatpush.msrb.mxu2 %v1579_v12  ;;  %v232_v33 = vand.u32 4294901760, %v231_v32  ;;  %v2340_v34 = vand.u32 4294901760, %v1498_v43  ;;  %v464_v49 = vand.u32 4294901760, %v463_v39  ;;  %v470_v43 = vand.u32 4294901760, %v469_v23 }
  0xad   :  { %447 = vmatpush.msrb.mxu3 %v446_v29  ;;  %v481_v20 = vsub.f32 %v1760_v58, %v480_v0  ;;  %v476_v3 = vand.u32 4294901760, %v475_v5 }
  0xae   :  { %333 = vmatpush.msrb.mxu0 %v2339_v62  ;;  %401 = vmatpush.msrb.mxu2 %v1588_v19 }
  0xaf   :  { %453 = vmatpush.msrb.mxu3 %v452_v28  ;;  %233 = vmatpush.msra.mxu1 %v232_v33 }
  0xb0   :  { %337 = vmatpush.msrb.mxu0 %v2340_v34  ;;  %403 = vmatpush.msrb.mxu2 %v1638_v56 }
  0xb1   :  { %367 = vmatpush.msrb.mxu1 %v1449_v25  ;;  %459 = vmatpush.msrb.mxu3 %v458_v55  ;;  %v2342_v25 = vand.u32 4294901760, %v1594_v21 }
  0xb2   :  { %341 = vmatpush.msrb.mxu0 %v2341_v22  ;;  %405 = vmatpush.msrb.mxu2 %v1624_v50 }
  0xb3   :  { %369 = vmatpush.msrb.mxu1 %v1447_v24  ;;  %465 = vmatpush.msrb.mxu3 %v464_v49  ;;  %v2343_v24 = vand.u32 4294901760, %v1667_v6 }
  0xb4   :  { %345 = vmatpush.msrb.mxu0 %v2342_v25  ;;  %407 = vmatpush.msrb.mxu2 %v1673_v16 }
  0xb5   :  { %371 = vmatpush.msrb.mxu1 %v1424_v15  ;;  %471 = vmatpush.msrb.mxu3 %v470_v43  ;;  %v482_v15 = vand.u32 4294901760, %v481_v20 }
  0xb6   :  { %307 = vmatmul.f32.vlgmr.msra.gmra.mxu3 %v1687_v36  ;;  %349 = vmatpush.msrb.mxu0 %v2343_v24 }
  0xb7   :  { %373 = vmatpush.msrb.mxu1 %v1504_v45  ;;  %409 = vmatpush.msrb.mxu2 %v1689_v18  ;;  %v2344_v45 = vand.u32 4294901760, %v1617_v46 }
  0xb8   :  { %477 = vmatpush.msrb.mxu3 %v476_v3  ;;  %353 = vmatpush.msrb.mxu0 %v230_v57 }
  0xb9   :  { %375 = vmatpush.msrb.mxu1 %v1465_v31  ;;  %411 = vmatpush.msrb.mxu2 %v1729_v41  ;;  %v2345_v31 = vand.u32 4294901760, %v1614_v42 }
  0xba   :  { %483 = vmatpush.msrb.mxu3 %v482_v15  ;;  %235 = vmatmul.f32.vlgmr.msra.gmra.mxu1 %v1599_v35 }
  0xbb   :  { %498 = vmatpush.msra.mxu0 %v1617_v46  ;;  %377 = vmatpush.msrb.mxu1 %v1574_v9  ;;  %v2346_v9 = vand.u32 4294901760, %v1627_v51 }
  0xbc   :  { %617 = vmatpush.msra.mxu3 %v1581_v13  ;;  %413 = vmatpush.msrb.mxu2 %v1739_v54 }
  0xbd   :  { %419 = vmatmul.f32.vlgmr.msrb.gmra.mxu2 %v168_v27  ;;  %501 = vmatpush.msra.mxu0 %v1614_v42 }
  0xbe   :  { %571 = vmatpush.msra.mxu2 %v2344_v45  ;;  %619 = vmatpush.msra.mxu3 %v1579_v12 }
  0xbf   :  { %379 = vmatpush.msrb.mxu1 %v1576_v10  ;;  %485 = vmatmul.f32.vlgmr.msrb.gmra.mxu3 %v1599_v35  ;;  %v129_v10 = vld [vmem:[%s2302_s2] sm:$0xff] }
  0xc0   :  { %504 = vmatpush.msra.mxu0 %v1627_v51  ;;  %575 = vmatpush.msra.mxu2 %v2345_v31 }
  0xc1   :  { %621 = vmatpush.msra.mxu3 %v1588_v19  ;;  %381 = vmatpush.msrb.mxu1 %v1653_v63 }
  0xc2   :  { %355 = vmatmul.f32.vlgmr.msrb.gmra.mxu0 %v1599_v35  ;;  %579 = vmatpush.msra.mxu2 %v2346_v9  ;;  %v706_v9 = vld [vmem:[#allocation2 + $0x8] sm:$0xff] }
  0xc3   :  { %507 = vmatpush.msra.mxu0 %v1671_v11  ;;  %623 = vmatpush.msra.mxu3 %v1638_v56 }
  0xc4   :  { %383 = vmatpush.msrb.mxu1 %v1725_v30  ;;  %583 = vmatpush.msra.mxu2 %v450_v1 }
  0xc5   :  { %385 = vmatmul.f32.vlgmr.msrb.gmra.mxu1 %v1599_v35  ;;  %510 = vmatpush.msra.mxu0 %v1659_v53 }
  0xc6   :  { %537 = vmatpush.msra.mxu1 %v1581_v13  ;;  %625 = vmatpush.msra.mxu3 %v1624_v50 }
  0xc7   :  { %132 = vperm.xlu1 %1254, %v129_v10   ;;  %513 = vmatpush.msra.mxu0 %v1712_v2 }
  0xc8   :  { %539 = vmatpush.msra.mxu1 %v1579_v12  ;;  %587 = vmatpush.msra.mxu2 %v456_v26 }
  0xc9   :  { %627 = vmatpush.msra.mxu3 %v1673_v16  ;;  %516 = vmatpush.msra.mxu0 %v1732_v60 }
  0xca   :  { %541 = vmatpush.msra.mxu1 %v1588_v19  ;;  %591 = vmatpush.msra.mxu2 %v462_v47 }
  0xcb   :  { %629 = vmatpush.msra.mxu3 %v1689_v18  ;;  %519 = vmatpush.msra.mxu0 %v1752_v59 }
  0xcc   :  { %543 = vmatpush.msra.mxu1 %v1638_v56  ;;  %595 = vmatpush.msra.mxu2 %v468_v52 }
  0xcd   :  { %631 = vmatpush.msra.mxu3 %v1729_v41  ;;  %522 = vmatpush.msra.mxu0 %v1760_v58 }
  0xce   :  { %545 = vmatpush.msra.mxu1 %v1624_v50  ;;  %599 = vmatpush.msra.mxu2 %v474_v17 }
  0xcf   :  { %633 = vmatpush.msra.mxu3 %v1739_v54  ;;  %525 = vmatmul.f32.vlgmr.msra.gmra.mxu0 %v1649_v61 }
  0xd0   :  { %547 = vmatpush.msra.mxu1 %v1673_v16  ;;  %603 = vmatpush.msra.mxu2 %v480_v0 }
  0xd1   :  { %605 = vmatmul.f32.vlgmr.msra.gmra.mxu2 %v1599_v35  ;;  %635 = vmatmul.f32.vlgmr.msra.gmra.mxu3 %v1599_v35 }
  0xd2   :  { %549 = vmatpush.msra.mxu1 %v1689_v18 }
  0xd4   :  { %551 = vmatpush.msra.mxu1 %v1729_v41 }
  0xd6   :  { %553 = vmatpush.msra.mxu1 %v1739_v54 }
  0xd7   :  { %557 = vmatmul.f32.vlgmr.msra.gmra.mxu1 %v1687_v36 }
 0x124   :  { %v170_v59 = vpop.f32.mrf.mxu0 }
 0x12c   :  { %v276_v42 = vpop.f32.mrf.mxu2 }
 0x137   :  { %v236_v12 = vpop.f32.mrf.mxu1 }
 0x139   :  { %v133_v13 = vpop.permute.xlu1 %132  ;;  %v308_v50 = vpop.f32.mrf.mxu3 }
 0x13a   :  { %v171_v19 = vadd.f32 %v170_v59, %v133_v13 }
 0x13c   :  { %v237_v21 = vadd.f32 %v236_v12, %v171_v19 }
 0x13e   :  { %v277_v46 = vadd.f32 %v276_v42, %v237_v21  ;;  %v1950_v21 = vsel %vm135_vm6, %v706_v9, 0 }
 0x13f   :  { %v356_v51 = vpop.f32.mrf.mxu0 }
 0x140   :  { %v309_v56 = vadd.f32 %v308_v50, %v277_v46  ;;  %v420_v54 = vpop.f32.mrf.mxu2 }
 0x141   :  { %v421_v41 = vadd.f32 %v420_v54, %v133_v13 }
 0x142   :  { %v357_v61 = vadd.f32 %v356_v51, %v309_v56  ;;  %v386_v35 = vpop.f32.mrf.mxu1  ;;  %v486_v6 = vpop.f32.mrf.mxu3 }
 0x143   :  { %v487_v16 = vadd.f32 %v486_v6, %v421_v41 }
 0x144   :  { %v387_v63 = vadd.f32 %v386_v35, %v357_v61 }
 0x146   :  { %v639_v53 = vmax.f32 %v387_v63, 0.0 }
 0x148   :  { %681 = vrot.lane.b32.xlu0 %v639_v53, %s1315_s1  ;;  %689 = vrot.lane.b32.xlu1 %v639_v53, %s1313_s21  ;;  %v1896_v62 = vand.u32 4294901760, %v639_v53 }
 0x149   :  { %697 = vrot.lane.b32.xlu2 %v639_v53, %s1314_s22 }
 0x14a   :  { %v1919_v24 = vsub.f32 %v639_v53, %v1896_v62 }
 0x14c   :  { %v526_v11 = vpop.f32.mrf.mxu0  ;;  %v784_v50 = vand.u32 4294901760, %v1919_v24 }
 0x14d   :  { %v527_v27 = vadd.f32 %v526_v11, %v487_v16 }
 0x150   :  { %657 = vrot.lane.b32.xlu0 %v639_v53, %s1318_s27  ;;  %665 = vrot.lane.b32.xlu1 %v639_v53, %s1317_s26 }
 0x151   :  { %673 = vrot.lane.b32.xlu2 %v639_v53, %s1316_s25 }
 0x154   :  { %v558_v36 = vpop.f32.mrf.mxu1  ;;  %v606_v18 = vpop.f32.mrf.mxu2 }
 0x155   :  { %v559_v26 = vadd.f32 %v558_v36, %v527_v27  ;;  %v636_v2 = vpop.f32.mrf.mxu3 }
 0x157   :  { %v607_v1 = vadd.f32 %v606_v18, %v559_v26 }
 0x159   :  { %v637_v30 = vadd.f32 %v636_v2, %v607_v1  ;;  %649 = vrot.lane.b32.xlu2 %v639_v53, %s1319_s28 }
 0x15b   :  { %v1869_v60 = vmax.f32 %v637_v30, 0.0 }
 0x15d   :  { %699 = vrot.lane.b32.xlu0 %v1869_v60, %s1314_s22  ;;  %683 = vrot.lane.b32.xlu1 %v1869_v60, %s1315_s1  ;;  %v1990_v36 = vand.u32 4294901760, %v1869_v60 }
 0x161   :  { %691 = vrot.lane.b32.xlu2 %v1869_v60, %s1313_s21 }
 0x165   :  { %675 = vrot.lane.b32.xlu0 %v1869_v60, %s1316_s25  ;;  %659 = vrot.lane.b32.xlu1 %v1869_v60, %s1318_s27 }
 0x169   :  { %667 = vrot.lane.b32.xlu2 %v1869_v60, %s1317_s26 }
 0x16d   :  { %651 = vrot.lane.b32.xlu0 %v1869_v60, %s1319_s28  ;;  %641 = vrot.lane.b32.xlu1 %v639_v53, %s1320_s29 }
 0x171   :  { %643 = vrot.lane.b32.xlu2 %v1869_v60, %s1320_s29 }
 0x1a3   :  { %v698_v57 = vpop.permute.xlu2 %697 }
 0x1ab   :  { %v674_v47 = vpop.permute.xlu2 %673 }
 0x1b3   :  { %v1888_v29 = vpop.permute.xlu2 %649 }
 0x1ba   :  { %v682_v32 = vpop.permute.xlu0 %681  ;;  %v690_v52 = vpop.permute.xlu1 %689 }
 0x1bb   :  { %v692_v58 = vpop.permute.xlu2 %691 }
 0x1bc   :  { %v693_v55 = vsel %vm114_vm5, %v690_v52, %v692_v58  ;;  %v694_v49 = vsel %vm114_vm5, %v692_v58, %v690_v52  ;;  %vm2349_vm5 = vmand %vm1398_vm1, %vm1394_vm0 }
 0x1bd   :  { %v695_v39 = vsel %vm1398_vm1, %v693_v55, 0.0  ;;  %v696_v8 = vsel %vm1486_vm10, %v694_v49, 0.0  ;;  %vm2350_vm1 = vmand %vm1486_vm10, %vm1473_vm9 }
 0x1be   :  { %v1898_v17 = vand.u32 4294901760, %v695_v39  ;;  %v1952_v42 = vand.u32 4294901760, %v696_v8  ;;  %vm2354_vm10 = vmand %vm1510_vm12, %vm1418_vm4 }
 0x1c0   :  { %v1922_v3 = vsub.f32 %v695_v39, %v1898_v17  ;;  %v1993_v18 = vsub.f32 %v696_v8, %v1952_v42 }
 0x1c2   :  { %v1890_v28 = vpop.permute.xlu0 %657  ;;  %v666_v33 = vpop.permute.xlu1 %665  ;;  %v766_v46 = vand.u32 4294901760, %v1922_v3 }
 0x1c3   :  { %v668_v23 = vpop.permute.xlu2 %667 }
 0x1c4   :  { %v670_v43 = vsel %vm87_vm14, %v668_v23, %v666_v33  ;;  %v669_v51 = vsel %vm87_vm14, %v666_v33, %v668_v23  ;;  %v767_v14 = vsub.f32 %v1922_v3, %v766_v46  ;;  %v2034_v23 = vsub.f32 %v1919_v24, %v784_v50 }
 0x1c5   :  { %v671_v10 = vsel %vm1394_vm0, %v670_v43, 0.0  ;;  %v1997_v26 = vsel %vm1473_vm9, %v669_v51, 0.0  ;;  %v1016_v43 = vand.u32 4294901760, %v1993_v18  ;;  %vm2356_vm14 = vcmp.lt.s32.totalorder %v1390_v4, 16 }
 0x1c6   :  { %v1960_v56 = vand.u32 4294901760, %v671_v10 }
 0x1c8   :  { %v2018_v52 = vsub.f32 %v671_v10, %v1960_v56 }
 0x1cb   :  { %v644_v49 = vpop.permute.xlu2 %643 }
 0x1cf   :  { %v700_v34 = vpop.permute.xlu0 %699  ;;  %v684_v0 = vpop.permute.xlu1 %683 }
 0x1d0   :  { %v701_v22 = vsel %vm2347_vm7, %v698_v57, %v700_v34  ;;  %v685_v5 = vsel %vm105_vm2, %v682_v32, %v684_v0  ;;  %v702_v15 = vsel %vm2347_vm7, %v700_v34, %v698_v57  ;;  %v686_v12 = vsel %vm105_vm2, %v684_v0, %v682_v32  ;;  %vm2359_vm7 = vmand %vm1605_vm8, %vm1500_vm11 }
 0x1d1   :  { %v703_v25 = vsel %vm2348_vm13, %v701_v22, 0.0  ;;  %v687_v20 = vsel %vm2349_vm5, %v685_v5, 0.0  ;;  %v704_v13 = vsel %vm55_vm15, %v702_v15, 0.0  ;;  %v688_v35 = vsel %vm2350_vm1, %v686_v12, 0.0  ;;  %vm2357_vm15 = vmmov %vm2356_vm14 }
 0x1d2   :  { %v1926_v45 = vand.u32 4294901760, %v703_v25  ;;  %v1928_v31 = vand.u32 4294901760, %v687_v20  ;;  %v1969_v54 = vand.u32 4294901760, %v704_v13  ;;  %vm2351_vm2 = vcmp.lt.s32.totalorder %v1390_v4, 127  ;;  %vm2358_vm5 = vmand %vm1510_vm12, %vm1394_vm0 }
 0x1d3   :  { %vm2352_vm6 = vmmov %vm2351_vm2  ;;  %vm2353_vm13 = vcmp.lt.s32.totalorder %v1390_v4, 15  ;;  %v2004_v1 = vand.u32 4294901760, %v688_v35  ;;  %v2015_v32 = vand.u32 4294901760, %v1950_v21  ;;  %v2038_v34 = vsub.f32 %v1869_v60, %v1990_v36 }
 0x1d4   :  { %v1935_v59 = vsub.f32 %v703_v25, %v1926_v45  ;;  %725 = vmatpush.msrb.mxu0 %v1926_v45  ;;  %v1946_v19 = vsub.f32 %v687_v20, %v1928_v31  ;;  %865 = vmatpush.msrb.mxu3 %v1926_v45  ;;  %v2021_v58 = vsub.f32 %v704_v13, %v1969_v54  ;;  %v2041_v0 = vand.u32 4294901760, %v1997_v26  ;;  %vm2360_vm0 = vmand %vm1605_vm8, %vm1473_vm9 }
 0x1d5   :  { %v768_v5 = vand.u32 4294901760, %v767_v14  ;;  %v2049_v25 = vsub.f32 %v688_v35, %v2004_v1 }
 0x1d6   :  { %727 = vmatpush.msrb.mxu0 %v1898_v17  ;;  %826 = vmatpush.msrb.mxu2 %v1935_v59  ;;  %v760_v61 = vand.u32 4294901760, %v1935_v59  ;;  %v772_v27 = vand.u32 4294901760, %v1946_v19  ;;  %v1010_v10 = vand.u32 4294901760, %v2021_v58 }
 0x1d7   :  { %867 = vmatpush.msrb.mxu3 %v1898_v17  ;;  %v676_v63 = vpop.permute.xlu0 %675  ;;  %v660_v53 = vpop.permute.xlu1 %659 }
 0x1d8   :  { %v677_v41 = vsel %vm2351_vm2, %v674_v47, %v676_v63  ;;  %v678_v6 = vsel %vm2352_vm6, %v676_v63, %v674_v47  ;;  %v662_v40 = vsel %vm2353_vm13, %v660_v53, %v1890_v28  ;;  %729 = vmatpush.msrb.mxu0 %v1928_v31  ;;  %829 = vmatpush.msrb.mxu2 %v1922_v3 }
 0x1d9   :  { %v679_v11 = vsel %vm1418_vm4, %v677_v41, 0.0  ;;  %v663_v16 = vsel %vm2354_vm10, %v662_v40, 0.0  ;;  %869 = vmatpush.msrb.mxu3 %v1928_v31  ;;  %v680_v30 = vsel %vm1500_vm11, %v678_v6, 0.0  ;;  %v761_v47 = vsub.f32 %v1935_v59, %v760_v61  ;;  %vm2355_vm4 = vmmov %vm2353_vm13 }
 0x1da   :  { %v1999_v2 = vand.u32 4294901760, %v679_v11  ;;  %v2008_v57 = vand.u32 4294901760, %v663_v16  ;;  %832 = vmatpush.msrb.mxu2 %v1946_v19  ;;  %v773_v39 = vsub.f32 %v1946_v19, %v772_v27  ;;  %v2043_v22 = vand.u32 4294901760, %v680_v30 }
 0x1db   :  { %v762_v55 = vand.u32 4294901760, %v761_v47  ;;  %v661_v60 = vsel %vm2355_vm4, %v1890_v28, %v660_v53  ;;  %v790_v28 = vand.u32 4294901760, %v2018_v52 }
 0x1dc   :  { %v2024_v33 = vsub.f32 %v679_v11, %v1999_v2  ;;  %731 = vmatpush.msrb.mxu0 %v1999_v2  ;;  %871 = vmatpush.msrb.mxu3 %v1999_v2  ;;  %v2055_v20 = vsub.f32 %v663_v16, %v2008_v57  ;;  %v774_v53 = vand.u32 4294901760, %v773_v39  ;;  %v2079_v41 = vsub.f32 %v680_v30, %v2043_v22 }
 0x1dd   :  { %763 = vmatpush.msrb.mxu1 %v762_v55  ;;  %v1022_v11 = vand.u32 4294901760, %v2049_v25  ;;  %v1011_v30 = vsub.f32 %v2021_v58, %v1010_v10  ;;  %v791_v39 = vsub.f32 %v2018_v52, %v790_v28 }
 0x1de   :  { %733 = vmatpush.msrb.mxu0 %v1896_v62  ;;  %835 = vmatpush.msrb.mxu2 %v2024_v33  ;;  %v778_v8 = vand.u32 4294901760, %v2024_v33  ;;  %v796_v48 = vand.u32 4294901760, %v2055_v20 }
 0x1df   :  { %873 = vmatpush.msrb.mxu3 %v1896_v62  ;;  %v652_v15 = vpop.permute.xlu0 %651  ;;  %v642_v9 = vpop.permute.xlu1 %641  ;;  %769 = vmatpush.msrb.mxu1 %v768_v5  ;;  %v2124_v5 = vsub.f32 %v1997_v26, %v2041_v0  ;;  %v786_v26 = vand.u32 4294901760, %v2034_v23 }
 0x1e0   :  { %v654_v12 = vsel %vm2356_vm14, %v652_v15, %v1888_v29  ;;  %v646_v13 = vsel %vm60_vm3, %v644_v49, %v642_v9  ;;  %735 = vmatpush.msrb.mxu0 %v1960_v56  ;;  %v653_v51 = vsel %vm2357_vm15, %v1888_v29, %v652_v15  ;;  %838 = vmatpush.msrb.mxu2 %v1919_v24  ;;  %v664_v29 = vsel %vm2359_vm7, %v661_v60, 0.0 }
 0x1e1   :  { %v655_v35 = vsel %vm1510_vm12, %v654_v12, 0.0  ;;  %v647_v63 = vsel %vm2358_vm5, %v646_v13, 0.0  ;;  %875 = vmatpush.msrb.mxu3 %v1960_v56  ;;  %v645_v7 = vsel %vm60_vm3, %v642_v9, %v644_v49  ;;  %775 = vmatpush.msrb.mxu1 %v774_v53  ;;  %v779_v44 = vsub.f32 %v2024_v33, %v778_v8 }
 0x1e2   :  { %v2086_v6 = vand.u32 4294901760, %v655_v35  ;;  %v2088_v40 = vand.u32 4294901760, %v647_v63  ;;  %737 = vmatpush.msrb.mxu0 %v2008_v57  ;;  %841 = vmatpush.msrb.mxu2 %v2018_v52  ;;  %v656_v16 = vsel %vm1605_vm8, %v653_v51, 0.0  ;;  %v2112_v47 = vand.u32 4294901760, %v664_v29 }
 0x1e3   :  { %877 = vmatpush.msrb.mxu3 %v2008_v57  ;;  %v780_v55 = vand.u32 4294901760, %v779_v44  ;;  %v1017_v49 = vsub.f32 %v1993_v18, %v1016_v43  ;;  %v648_v60 = vsel %vm2360_vm0, %v645_v7, 0.0  ;;  %v1028_v9 = vand.u32 4294901760, %v2079_v41 }
 0x1e4   :  { %v2103_v14 = vsub.f32 %v655_v35, %v2086_v6  ;;  %v2106_v4 = vsub.f32 %v647_v63, %v2088_v40  ;;  %739 = vmatpush.msrb.mxu0 %v2086_v6  ;;  %844 = vmatpush.msrb.mxu2 %v2055_v20  ;;  %v2134_v12 = vand.u32 4294901760, %v656_v16  ;;  %v797_v38 = vsub.f32 %v2055_v20, %v796_v48 }
 0x1e5   :  { %879 = vmatpush.msrb.mxu3 %v2086_v6  ;;  %781 = vmatpush.msrb.mxu1 %v780_v55  ;;  %v1012_v13 = vand.u32 4294901760, %v1011_v30  ;;  %v1023_v51 = vsub.f32 %v2049_v25, %v1022_v11  ;;  %v2151_v23 = vsub.f32 %v664_v29, %v2112_v47  ;;  %v2153_v63 = vand.u32 4294901760, %v648_v60 }
 0x1e6   :  { %v802_v15 = vand.u32 4294901760, %v2103_v14  ;;  %741 = vmatpush.msrb.mxu0 %v2088_v40  ;;  %v808_v37 = vand.u32 4294901760, %v2106_v4  ;;  %847 = vmatpush.msrb.mxu2 %v2103_v14  ;;  %v792_v53 = vand.u32 4294901760, %v791_v39  ;;  %v1034_v7 = vand.u32 4294901760, %v2038_v34 }
 0x1e7   :  { %881 = vmatpush.msrb.mxu3 %v2088_v40  ;;  %787 = vmatpush.msrb.mxu1 %v786_v26  ;;  %v2160_v44 = vsub.f32 %v1950_v21, %v2015_v32  ;;  %v1018_v30 = vand.u32 4294901760, %v1017_v49  ;;  %v1029_v29 = vsub.f32 %v2079_v41, %v1028_v9  ;;  %v1040_v55 = vand.u32 4294901760, %v2124_v5 }
 0x1e8   :  { %v803_v35 = vsub.f32 %v2103_v14, %v802_v15  ;;  %899 = vmatpush.msra.mxu0 %v760_v61  ;;  %850 = vmatpush.msrb.mxu2 %v2106_v4  ;;  %v2168_v59 = vsub.f32 %v656_v16, %v2134_v12  ;;  %v798_v61 = vand.u32 4294901760, %v797_v38  ;;  %v809_v39 = vsub.f32 %v2106_v4, %v808_v37 }
 0x1e9   :  { %1013 = vmatpush.msra.mxu3 %v1012_v13  ;;  %793 = vmatpush.msrb.mxu1 %v792_v53  ;;  %v1024_v49 = vand.u32 4294901760, %v1023_v51  ;;  %v2177_v26 = vsub.f32 %v648_v60, %v2153_v63  ;;  %v1035_v3 = vsub.f32 %v2038_v34, %v1034_v7  ;;  %v1030_v16 = vand.u32 4294901760, %v1029_v29 }
 0x1ea   :  { %903 = vmatpush.msra.mxu0 %v766_v46  ;;  %v804_v21 = vand.u32 4294901760, %v803_v35  ;;  %975 = vmatpush.msra.mxu2 %v1969_v54  ;;  %v1046_v46 = vand.u32 4294901760, %v2151_v23  ;;  %v810_v60 = vand.u32 4294901760, %v809_v39  ;;  %v1041_v19 = vsub.f32 %v2124_v5, %v1040_v55 }
 0x1eb   :  { %1019 = vmatpush.msra.mxu3 %v1018_v30  ;;  %799 = vmatpush.msrb.mxu1 %v798_v61  ;;  %v2193_v38 = vand.u32 4294901760, %v2160_v44  ;;  %v1036_v13 = vand.u32 4294901760, %v1035_v3 }
 0x1ec   :  { %907 = vmatpush.msra.mxu0 %v772_v27  ;;  %977 = vmatpush.msra.mxu2 %v1952_v42  ;;  %v1052_v27 = vand.u32 4294901760, %v2168_v59  ;;  %v1047_v33 = vsub.f32 %v2151_v23, %v1046_v46  ;;  %v1042_v51 = vand.u32 4294901760, %v1041_v19 }
 0x1ed   :  { %1025 = vmatpush.msra.mxu3 %v1024_v49  ;;  %805 = vmatpush.msrb.mxu1 %v804_v21 }
 0x1ee   :  { %911 = vmatpush.msra.mxu0 %v778_v8  ;;  %979 = vmatpush.msra.mxu2 %v2004_v1  ;;  %v1058_v8 = vand.u32 4294901760, %v2177_v26  ;;  %v1053_v24 = vsub.f32 %v2168_v59, %v1052_v27 }
 0x1ef   :  { %1031 = vmatpush.msra.mxu3 %v1030_v16  ;;  %811 = vmatpush.msrb.mxu1 %v810_v60 }
 0x1f0   :  { %915 = vmatpush.msra.mxu0 %v784_v50  ;;  %981 = vmatpush.msra.mxu2 %v2043_v22  ;;  %v745_v50 = vsub.f32 %v2160_v44, %v2193_v38  ;;  %v1059_v52 = vsub.f32 %v2177_v26, %v1058_v8 }
 0x1f1   :  { %945 = vmatpush.msra.mxu1 %v1926_v45  ;;  %1037 = vmatpush.msra.mxu3 %v1036_v13  ;;  %v1048_v45 = vand.u32 4294901760, %v1047_v33 }
 0x1f2   :  { %919 = vmatpush.msra.mxu0 %v790_v28  ;;  %983 = vmatpush.msra.mxu2 %v1990_v36  ;;  %v746_v28 = vand.u32 4294901760, %v745_v50  ;;  %v1060_v20 = vand.u32 4294901760, %v1059_v52 }
 0x1f3   :  { %947 = vmatpush.msra.mxu1 %v1898_v17  ;;  %1043 = vmatpush.msra.mxu3 %v1042_v51  ;;  %v1054_v17 = vand.u32 4294901760, %v1053_v24 }
 0x1f4   :  { %923 = vmatpush.msra.mxu0 %v796_v48  ;;  %985 = vmatpush.msra.mxu2 %v2041_v0 }
 0x1f5   :  { %949 = vmatpush.msra.mxu1 %v1928_v31  ;;  %1049 = vmatpush.msra.mxu3 %v1048_v45 }
 0x1f6   :  { %927 = vmatpush.msra.mxu0 %v802_v15  ;;  %987 = vmatpush.msra.mxu2 %v2112_v47 }
 0x1f7   :  { %951 = vmatpush.msra.mxu1 %v1999_v2  ;;  %1055 = vmatpush.msra.mxu3 %v1054_v17 }
 0x1f8   :  { %931 = vmatpush.msra.mxu0 %v808_v37  ;;  %989 = vmatpush.msra.mxu2 %v2134_v12 }
 0x1f9   :  { %953 = vmatpush.msra.mxu1 %v1896_v62  ;;  %1061 = vmatpush.msra.mxu3 %v1060_v20  ;;  %v1240_v62 = vld [vmem:[%s2302_s2 + $0x8] sm:$0xff] }
 0x1fa   :  { %747 = vmatmul.f32.vlgmr.msrb.gmra.mxu0 %v746_v28  ;;  %885 = vmatmul.f32.vlgmr.msrb.gmra.mxu3 %v2193_v38 }
 0x1fb   :  { %1076 = vmatpush.msrb.mxu0 %v2021_v58  ;;  %1195 = vmatpush.msrb.mxu3 %v1969_v54 }
 0x1fc   :  { %955 = vmatpush.msra.mxu1 %v1960_v56  ;;  %991 = vmatpush.msra.mxu2 %v2153_v63 }
 0x1fd   :  { %1079 = vmatpush.msrb.mxu0 %v1993_v18  ;;  %853 = vmatmul.f32.vlgmr.msrb.gmra.mxu2 %v2160_v44 }
 0x1fe   :  { %1197 = vmatpush.msrb.mxu3 %v1952_v42  ;;  %1149 = vmatpush.msrb.mxu2 %v1010_v10 }
 0x1ff   :  { %957 = vmatpush.msra.mxu1 %v2008_v57  ;;  %1082 = vmatpush.msrb.mxu0 %v2049_v25 }
 0x200   :  { %1199 = vmatpush.msrb.mxu3 %v2004_v1  ;;  %1153 = vmatpush.msrb.mxu2 %v1016_v43 }
 0x201   :  { %959 = vmatpush.msra.mxu1 %v2086_v6  ;;  %1085 = vmatpush.msrb.mxu0 %v2079_v41 }
 0x202   :  { %1201 = vmatpush.msrb.mxu3 %v2043_v22  ;;  %1157 = vmatpush.msrb.mxu2 %v1022_v11 }
 0x203   :  { %961 = vmatpush.msra.mxu1 %v2088_v40  ;;  %1088 = vmatpush.msrb.mxu0 %v2038_v34 }
 0x204   :  { %813 = vmatmul.f32.vlgmr.msrb.gmra.mxu1 %v2015_v32  ;;  %1161 = vmatpush.msrb.mxu2 %v1028_v9 }
 0x205   :  { %1115 = vmatpush.msrb.mxu1 %v1969_v54  ;;  %1203 = vmatpush.msrb.mxu3 %v1990_v36 }
 0x206   :  { %1091 = vmatpush.msrb.mxu0 %v2124_v5  ;;  %1165 = vmatpush.msrb.mxu2 %v1034_v7 }
 0x207   :  { %1117 = vmatpush.msrb.mxu1 %v1952_v42  ;;  %1205 = vmatpush.msrb.mxu3 %v2041_v0 }
 0x208   :  { %1094 = vmatpush.msrb.mxu0 %v2151_v23  ;;  %1169 = vmatpush.msrb.mxu2 %v1040_v55 }
 0x209   :  { %1119 = vmatpush.msrb.mxu1 %v2004_v1  ;;  %1207 = vmatpush.msrb.mxu3 %v2112_v47 }
 0x20a   :  { %997 = vmatmul.f32.vlgmr.msra.gmra.mxu2 %v746_v28  ;;  %933 = vmatmul.f32.vlgmr.msra.gmra.mxu0 %v2015_v32 }
 0x20b   :  { %1121 = vmatpush.msrb.mxu1 %v2043_v22  ;;  %1097 = vmatpush.msrb.mxu0 %v2168_v59 }
 0x20c   :  { %1173 = vmatpush.msrb.mxu2 %v1046_v46  ;;  %1209 = vmatpush.msrb.mxu3 %v2134_v12 }
 0x20d   :  { %963 = vmatmul.f32.vlgmr.msra.gmra.mxu1 %v2015_v32  ;;  %1063 = vmatmul.f32.vlgmr.msra.gmra.mxu3 %v2015_v32 }
 0x20e   :  { %1100 = vmatpush.msrb.mxu0 %v2177_v26  ;;  %1123 = vmatpush.msrb.mxu1 %v1990_v36 }
 0x20f   :  { %1177 = vmatpush.msrb.mxu2 %v1052_v27  ;;  %1211 = vmatpush.msrb.mxu3 %v2153_v63 }
 0x210   :  { %711 = vperm.xlu0 %1255, %v1240_v62   ;;  %1125 = vmatpush.msrb.mxu1 %v2041_v0 }
 0x211   :  { %1181 = vmatpush.msrb.mxu2 %v1058_v8 }
 0x212   :  { %1183 = vmatmul.f32.vlgmr.msrb.gmra.mxu2 %v2015_v32  ;;  %1127 = vmatpush.msrb.mxu1 %v2112_v47 }
 0x213   :  { %1103 = vmatmul.f32.vlgmr.msrb.gmra.mxu0 %v2160_v44 }
 0x214   :  { %1129 = vmatpush.msrb.mxu1 %v2134_v12  ;;  %v1257_v12 = vld [vmem:[%s2300_s0 + $0x8] sm:$0xff] }
 0x215   :  { %1213 = vmatmul.f32.vlgmr.msrb.gmra.mxu3 %v2015_v32  ;;  %v1256_v32 = vld [vmem:[%s2300_s0] sm:$0xff] }
 0x216   :  { %1131 = vmatpush.msrb.mxu1 %v2153_v63 }
 0x217   :  { %1135 = vmatmul.f32.vlgmr.msrb.gmra.mxu1 %v2193_v38 }
 0x277   :  { %v748_v31 = vpop.f32.mrf.mxu0 }
 0x27d   :  { %v886_v2 = vpop.f32.mrf.mxu3 }
 0x280   :  { %v854_v36 = vpop.f32.mrf.mxu2 }
 0x281   :  { %v814_v42 = vpop.f32.mrf.mxu1 }
 0x282   :  { %v712_v56 = vpop.permute.xlu0 %711 }
 0x283   :  { %v749_v54 = vadd.f32 %v748_v31, %v712_v56 }
 0x285   :  { %v815_v18 = vadd.f32 %v814_v42, %v749_v54 }
 0x287   :  { %v855_v1 = vadd.f32 %v854_v36, %v815_v18  ;;  %v934_v57 = vpop.f32.mrf.mxu0 }
 0x289   :  { %v887_v58 = vadd.f32 %v886_v2, %v855_v1 }
 0x28a   :  { %v964_v34 = vpop.f32.mrf.mxu1 }
 0x28b   :  { %v935_v0 = vadd.f32 %v934_v57, %v887_v58 }
 0x28d   :  { %v965_v22 = vadd.f32 %v964_v34, %v935_v0  ;;  %v998_v43 = vpop.f32.mrf.mxu2 }
 0x28e   :  { %v999_v25 = vadd.f32 %v998_v43, %v712_v56 }
 0x28f   :  { %v1217_v10 = vadd.f32 %v1256_v32, %v965_v22 }
 0x290   :  { %v1064_v6 = vpop.f32.mrf.mxu3  ;;  %v1104_v40 = vpop.f32.mrf.mxu0 }
 0x291   :  { %v1219_v41 = vmax.f32 %v1217_v10, 0.0  ;;  %v1065_v48 = vadd.f32 %v1064_v6, %v999_v25 }
 0x293   :  { %1221 = vst [vmem:[#allocation5] sm:$0xff] %v1219_v41  ;;  %v1105_v11 = vadd.f32 %v1104_v40, %v1065_v48 }
 0x294   :  { %v1136_v14 = vpop.f32.mrf.mxu1 }
 0x295   :  { %v1184_v4 = vpop.f32.mrf.mxu2  ;;  %v1137_v47 = vadd.f32 %v1136_v14, %v1105_v11 }
 0x297   :  { %v1185_v5 = vadd.f32 %v1184_v4, %v1137_v47 }
 0x298   :  { %v1214_v15 = vpop.f32.mrf.mxu3 }
 0x299   :  { %v1215_v9 = vadd.f32 %v1214_v15, %v1185_v5 }
 0x29b   :  { %v1218_v37 = vadd.f32 %v1257_v12, %v1215_v9 }
 0x29d   :  { %v1220_v35 = vmax.f32 %v1218_v37, 0.0 }
 0x29f   :  { %1222 = vst [vmem:[#allocation5 + $0x8] sm:$0xff] %v1220_v35 }
 0x2a0   :  { %1233 = dma.vmem_to_hbm [thread:$0]  %s1229_s9, 256, %s1231_s12, [#allocation4]  }
 0x2a1   :  { %1308 = dma.done.wait [#allocation4], 256  }
 0x2a2   :  { %1309 = vsyncadd [#allocation4], 4294967040 }
 0x2a3   :  { %1238 = vsyncpa [#allocation3], 1 }
 0x2a4   :  { %1239 = vsyncpa [#allocation4], 1 }

</bundles_post_ra>
